<compile_context>
chip_gen: v6e
topology: v6e:2x2x1
jax: 0.10.0
libtpu: 0.0.40
codegen_flags: <defaults>
</compile_context>

<pallas_src>
import jax
import jax.numpy as jnp
from jax.experimental import pallas as pl
from jax.experimental.pallas import tpu as pltpu

N_STATE = 64
N_ACTION = 9
HIDDEN = 128
N_OUT_PAD = 128     # lane-padded final layer width (dense vst / HBM writeback)
TB_MAX = 512        # batch-tile rows per grid step (fits default scoped VMEM on v5e too)


def _round_up(x, m):
    return ((x + m - 1) // m) * m


def qnetwork_kernel(x_ref,
                    w1_ref, b1_ref,
                    w2_ref, b2_ref,
                    w3_ref, b3_ref,
                    w4_ref, b4_ref,
                    o_ref):
    # Weights are bf16; matmuls accumulate in f32; bias-add/ReLU stay f32.
    x = x_ref[...].astype(jnp.bfloat16)
    h = jnp.dot(x, w1_ref[...], preferred_element_type=jnp.float32)
    h = jnp.maximum(h + b1_ref[...], 0.0)
    h = jnp.dot(h.astype(jnp.bfloat16), w2_ref[...], preferred_element_type=jnp.float32)
    h = jnp.maximum(h + b2_ref[...], 0.0)
    h = jnp.dot(h.astype(jnp.bfloat16), w3_ref[...], preferred_element_type=jnp.float32)
    h = jnp.maximum(h + b3_ref[...], 0.0)
    out = jnp.dot(h.astype(jnp.bfloat16), w4_ref[...], preferred_element_type=jnp.float32)
    o_ref[...] = out + b4_ref[...]


def qnetwork_forward(state, kp):
    """state: [B, N_STATE] f32; kp: kernel-ready params (bf16 weights, padded fc4)."""
    B = state.shape[0]
    # Pick the batch tile: whole (8-row aligned) batch when small, else TB_MAX tiles.
    if B <= TB_MAX:
        B_pad = _round_up(B, 8)
        TB = B_pad
    else:
        TB = TB_MAX
        B_pad = _round_up(B, TB)
    if B_pad != B:
        state = jnp.pad(state, ((0, B_pad - B), (0, 0)))

    grid = (B_pad // TB,)
    const = lambda i: (0, 0)   # parameters: same block every step -> stay VMEM-resident

    in_specs = [
        pl.BlockSpec((TB, N_STATE), lambda i: (i, 0)),
        pl.BlockSpec((N_STATE, HIDDEN), const), pl.BlockSpec((1, HIDDEN), const),
        pl.BlockSpec((HIDDEN, HIDDEN), const), pl.BlockSpec((1, HIDDEN), const),
        pl.BlockSpec((HIDDEN, HIDDEN), const), pl.BlockSpec((1, HIDDEN), const),
        pl.BlockSpec((HIDDEN, N_OUT_PAD), const), pl.BlockSpec((1, N_OUT_PAD), const),
    ]
    out_specs = pl.BlockSpec((TB, N_OUT_PAD), lambda i: (i, 0))

    flops = 2 * B_pad * (N_STATE * HIDDEN + 2 * HIDDEN * HIDDEN + HIDDEN * N_OUT_PAD)
    weight_bytes = 2 * (N_STATE * HIDDEN + 2 * HIDDEN * HIDDEN + HIDDEN * N_OUT_PAD)  # bf16
    bias_bytes = 4 * (3 * HIDDEN + N_OUT_PAD)
    bytes_accessed = 4 * B_pad * N_STATE + weight_bytes + bias_bytes + 4 * B_pad * N_OUT_PAD

    out = pl.pallas_call(
        qnetwork_kernel,
        out_shape=jax.ShapeDtypeStruct((B_pad, N_OUT_PAD), jnp.float32),
        grid=grid,
        in_specs=in_specs,
        out_specs=out_specs,
        compiler_params=pltpu.CompilerParams(
            dimension_semantics=("parallel",)),   # v7x: batch tiles across both TCs
        cost_estimate=pl.CostEstimate(
            flops=flops, transcendentals=0, bytes_accessed=bytes_accessed),
    )(state,
      kp["w1"], kp["b1"], kp["w2"], kp["b2"],
      kp["w3"], kp["b3"], kp["w4"], kp["b4"])
    return out[:B, :N_ACTION]


def init_params(key):
    """f32 master params matching nn.Linear init; weights stored transposed [in, out]."""
    def linear(key, fan_in, fan_out):
        kw, kb = jax.random.split(key)
        bound = 1.0 / jnp.sqrt(fan_in)  # PyTorch default U(-1/sqrt(fan_in), 1/sqrt(fan_in))
        w = jax.random.uniform(kw, (fan_in, fan_out), jnp.float32, -bound, bound)
        b = jax.random.uniform(kb, (1, fan_out), jnp.float32, -bound, bound)
        return w, b

    k1, k2, k3, k4 = jax.random.split(key, 4)
    w1, b1 = linear(k1, N_STATE, HIDDEN)
    w2, b2 = linear(k2, HIDDEN, HIDDEN)
    w3, b3 = linear(k3, HIDDEN, HIDDEN)
    w4, b4 = linear(k4, HIDDEN, N_ACTION)
    return dict(w1=w1, b1=b1, w2=w2, b2=b2, w3=w3, b3=b3, w4=w4, b4=b4)


def prepare_params(p):
    """Kernel-ready params: bf16 weights, f32 biases, fc4 lane-padded to 128 outputs."""
    w4p = jnp.zeros((HIDDEN, N_OUT_PAD), jnp.float32).at[:, :N_ACTION].set(p["w4"])
    b4p = jnp.zeros((1, N_OUT_PAD), jnp.float32).at[:, :N_ACTION].set(p["b4"])
    return dict(
        w1=p["w1"].astype(jnp.bfloat16), b1=p["b1"],
        w2=p["w2"].astype(jnp.bfloat16), b2=p["b2"],
        w3=p["w3"].astype(jnp.bfloat16), b3=p["b3"],
        w4=w4p.astype(jnp.bfloat16), b4=b4p,
    )


def qnetwork_ref(state, p):
    """Pure-JAX reference emulating the kernel math (bf16 MXU inputs, f32 accumulate)."""
    def layer(x, w, b, relu):
        y = jnp.dot(x.astype(jnp.bfloat16).astype(jnp.float32),
                    w.astype(jnp.bfloat16).astype(jnp.float32),
                    preferred_element_type=jnp.float32) + b
        return jnp.maximum(y, 0.0) if relu else y

    h = layer(state, p["w1"], p["b1"], True)
    h = layer(h, p["w2"], p["b2"], True)
    h = layer(h, p["w3"], p["b3"], True)
    return layer(h, p["w4"], p["b4"], False)


if __name__ == "__main__":
    key = jax.random.PRNGKey(0)
    k_param, k_s1, k_s2 = jax.random.split(key, 3)
    params = init_params(k_param)
    kparams = prepare_params(params)

    # Small batch (single tile, block == full array).
    B1 = 8
    state1 = jax.random.normal(k_s1, (B1, N_STATE), jnp.float32)
    q1 = jax.block_until_ready(qnetwork_forward(state1, kparams))
    assert q1.shape == (B1, N_ACTION)
    assert jnp.allclose(q1, qnetwork_ref(state1, params), atol=1e-2, rtol=1e-2)

    # Larger batch exercising the batch grid + tail padding (600 -> pad 1024, 2 tiles).
    B2 = 600
    state2 = jax.random.normal(k_s2, (B2, N_STATE), jnp.float32)
    q2 = jax.block_until_ready(qnetwork_forward(state2, kparams))
    assert q2.shape == (B2, N_ACTION)
    assert jnp.allclose(q2, qnetwork_ref(state2, params), atol=1e-2, rtol=1e-2)

    print("KERNEL_OK")
</pallas_src>

<mosaic_0001>
module attributes {stable_mosaic.version = 11 : i64} {
  func.func @qnetwork_kernel(%arg0: i32, %arg1: memref<8x64xf32, #tpu.memory_space<vmem>>, %arg2: memref<64x128xbf16, #tpu.memory_space<vmem>>, %arg3: memref<1x128xf32, #tpu.memory_space<vmem>>, %arg4: memref<128x128xbf16, #tpu.memory_space<vmem>>, %arg5: memref<1x128xf32, #tpu.memory_space<vmem>>, %arg6: memref<128x128xbf16, #tpu.memory_space<vmem>>, %arg7: memref<1x128xf32, #tpu.memory_space<vmem>>, %arg8: memref<128x128xbf16, #tpu.memory_space<vmem>>, %arg9: memref<1x128xf32, #tpu.memory_space<vmem>>, %arg10: memref<8x128xf32, #tpu.memory_space<vmem>>) attributes {dimension_semantics = [#tpu.dimension_semantics<parallel>], iteration_bounds = array<i64: 1>, scalar_prefetch = 0 : i64, scratch_operands = 0 : i64, tpu.core_type = #tpu.core_type<tc>, window_params = [{transform_indices = @transform_0, window_bounds = array<i64: 8, 64>}, {pipeline_mode = #tpu.pipeline_mode<synchronous>, transform_indices = @transform_1, window_bounds = array<i64: 64, 128>}, {pipeline_mode = #tpu.pipeline_mode<synchronous>, transform_indices = @transform_2, window_bounds = array<i64: 1, 128>}, {pipeline_mode = #tpu.pipeline_mode<synchronous>, transform_indices = @transform_3, window_bounds = array<i64: 128, 128>}, {pipeline_mode = #tpu.pipeline_mode<synchronous>, transform_indices = @transform_4, window_bounds = array<i64: 1, 128>}, {pipeline_mode = #tpu.pipeline_mode<synchronous>, transform_indices = @transform_5, window_bounds = array<i64: 128, 128>}, {pipeline_mode = #tpu.pipeline_mode<synchronous>, transform_indices = @transform_6, window_bounds = array<i64: 1, 128>}, {pipeline_mode = #tpu.pipeline_mode<synchronous>, transform_indices = @transform_7, window_bounds = array<i64: 128, 128>}, {pipeline_mode = #tpu.pipeline_mode<synchronous>, transform_indices = @transform_8, window_bounds = array<i64: 1, 128>}, {transform_indices = @transform_9, window_bounds = array<i64: 8, 128>}]} {
    %c0 = arith.constant 0 : index
    %c0_0 = arith.constant 0 : index
    %0 = vector.load %arg1[%c0, %c0_0] : memref<8x64xf32, #tpu.memory_space<vmem>>, vector<8x64xf32>
    %1 = arith.truncf %0 : vector<8x64xf32> to vector<8x64xbf16>
    %c0_1 = arith.constant 0 : index
    %c0_2 = arith.constant 0 : index
    %2 = vector.load %arg2[%c0_1, %c0_2] : memref<64x128xbf16, #tpu.memory_space<vmem>>, vector<64x128xbf16>
    %cst = arith.constant dense<0.000000e+00> : vector<8x128xf32>
    %3 = tpu.matmul %1, %2, %cst {dimension_numbers = #tpu.dot_dimension_numbers<[1], [0], [0], [1], [0, 0, 1, 1], [], []>} : vector<8x64xbf16>, vector<64x128xbf16>, vector<8x128xf32> -> vector<8x128xf32>
    %c0_3 = arith.constant 0 : index
    %c0_4 = arith.constant 0 : index
    %4 = vector.load %arg3[%c0_3, %c0_4] : memref<1x128xf32, #tpu.memory_space<vmem>>, vector<1x128xf32>
    %5 = vector.broadcast %4 : vector<1x128xf32> to vector<8x128xf32>
    %6 = arith.addf %3, %5 : vector<8x128xf32>
    %cst_5 = arith.constant 0.000000e+00 : f32
    %7 = vector.broadcast %cst_5 : f32 to vector<8x128xf32>
    %8 = arith.maximumf %6, %7 : vector<8x128xf32>
    %9 = arith.truncf %8 : vector<8x128xf32> to vector<8x128xbf16>
    %c0_6 = arith.constant 0 : index
    %c0_7 = arith.constant 0 : index
    %10 = vector.load %arg4[%c0_6, %c0_7] : memref<128x128xbf16, #tpu.memory_space<vmem>>, vector<128x128xbf16>
    %cst_8 = arith.constant dense<0.000000e+00> : vector<8x128xf32>
    %11 = tpu.matmul %9, %10, %cst_8 {dimension_numbers = #tpu.dot_dimension_numbers<[1], [0], [0], [1], [0, 0, 1, 1], [], []>} : vector<8x128xbf16>, vector<128x128xbf16>, vector<8x128xf32> -> vector<8x128xf32>
    %c0_9 = arith.constant 0 : index
    %c0_10 = arith.constant 0 : index
    %12 = vector.load %arg5[%c0_9, %c0_10] : memref<1x128xf32, #tpu.memory_space<vmem>>, vector<1x128xf32>
    %13 = vector.broadcast %12 : vector<1x128xf32> to vector<8x128xf32>
    %14 = arith.addf %11, %13 : vector<8x128xf32>
    %cst_11 = arith.constant 0.000000e+00 : f32
    %15 = vector.broadcast %cst_11 : f32 to vector<8x128xf32>
    %16 = arith.maximumf %14, %15 : vector<8x128xf32>
    %17 = arith.truncf %16 : vector<8x128xf32> to vector<8x128xbf16>
    %c0_12 = arith.constant 0 : index
    %c0_13 = arith.constant 0 : index
    %18 = vector.load %arg6[%c0_12, %c0_13] : memref<128x128xbf16, #tpu.memory_space<vmem>>, vector<128x128xbf16>
    %cst_14 = arith.constant dense<0.000000e+00> : vector<8x128xf32>
    %19 = tpu.matmul %17, %18, %cst_14 {dimension_numbers = #tpu.dot_dimension_numbers<[1], [0], [0], [1], [0, 0, 1, 1], [], []>} : vector<8x128xbf16>, vector<128x128xbf16>, vector<8x128xf32> -> vector<8x128xf32>
    %c0_15 = arith.constant 0 : index
    %c0_16 = arith.constant 0 : index
    %20 = vector.load %arg7[%c0_15, %c0_16] : memref<1x128xf32, #tpu.memory_space<vmem>>, vector<1x128xf32>
    %21 = vector.broadcast %20 : vector<1x128xf32> to vector<8x128xf32>
    %22 = arith.addf %19, %21 : vector<8x128xf32>
    %cst_17 = arith.constant 0.000000e+00 : f32
    %23 = vector.broadcast %cst_17 : f32 to vector<8x128xf32>
    %24 = arith.maximumf %22, %23 : vector<8x128xf32>
    %25 = arith.truncf %24 : vector<8x128xf32> to vector<8x128xbf16>
    %c0_18 = arith.constant 0 : index
    %c0_19 = arith.constant 0 : index
    %26 = vector.load %arg8[%c0_18, %c0_19] : memref<128x128xbf16, #tpu.memory_space<vmem>>, vector<128x128xbf16>
    %cst_20 = arith.constant dense<0.000000e+00> : vector<8x128xf32>
    %27 = tpu.matmul %25, %26, %cst_20 {dimension_numbers = #tpu.dot_dimension_numbers<[1], [0], [0], [1], [0, 0, 1, 1], [], []>} : vector<8x128xbf16>, vector<128x128xbf16>, vector<8x128xf32> -> vector<8x128xf32>
    %c0_21 = arith.constant 0 : index
    %c0_22 = arith.constant 0 : index
    %28 = vector.load %arg9[%c0_21, %c0_22] : memref<1x128xf32, #tpu.memory_space<vmem>>, vector<1x128xf32>
    %29 = vector.broadcast %28 : vector<1x128xf32> to vector<8x128xf32>
    %30 = arith.addf %27, %29 : vector<8x128xf32>
    %c0_23 = arith.constant 0 : index
    %c0_24 = arith.constant 0 : index
    %31 = vector.load %arg10[%c0_23, %c0_24] : memref<8x128xf32, #tpu.memory_space<vmem>>, vector<8x128xf32>
    tpu.vector_store %arg10[%c0_23, %c0_24], %30 {strides = array<i32>} : memref<8x128xf32, #tpu.memory_space<vmem>>, vector<8x128xf32>,
    return
  }
  func.func @transform_0(%arg0: i32) -> (i32, i32) {
    %c0_i32 = arith.constant 0 : i32
    %c0_i32_0 = arith.constant 0 : i32
    return %arg0, %c0_i32 : i32, i32
  }
  func.func @transform_1(%arg0: i32) -> (i32, i32) {
    %c0_i32 = arith.constant 0 : i32
    %c0_i32_0 = arith.constant 0 : i32
    %c0_i32_1 = arith.constant 0 : i32
    return %c0_i32, %c0_i32_0 : i32, i32
  }
  func.func @transform_2(%arg0: i32) -> (i32, i32) {
    %c0_i32 = arith.constant 0 : i32
    %c0_i32_0 = arith.constant 0 : i32
    %c0_i32_1 = arith.constant 0 : i32
    return %c0_i32, %c0_i32_0 : i32, i32
  }
  func.func @transform_3(%arg0: i32) -> (i32, i32) {
    %c0_i32 = arith.constant 0 : i32
    %c0_i32_0 = arith.constant 0 : i32
    %c0_i32_1 = arith.constant 0 : i32
    return %c0_i32, %c0_i32_0 : i32, i32
  }
  func.func @transform_4(%arg0: i32) -> (i32, i32) {
    %c0_i32 = arith.constant 0 : i32
    %c0_i32_0 = arith.constant 0 : i32
    %c0_i32_1 = arith.constant 0 : i32
    return %c0_i32, %c0_i32_0 : i32, i32
  }
  func.func @transform_5(%arg0: i32) -> (i32, i32) {
    %c0_i32 = arith.constant 0 : i32
    %c0_i32_0 = arith.constant 0 : i32
    %c0_i32_1 = arith.constant 0 : i32
    return %c0_i32, %c0_i32_0 : i32, i32
  }
  func.func @transform_6(%arg0: i32) -> (i32, i32) {
    %c0_i32 = arith.constant 0 : i32
    %c0_i32_0 = arith.constant 0 : i32
    %c0_i32_1 = arith.constant 0 : i32
    return %c0_i32, %c0_i32_0 : i32, i32
  }
  func.func @transform_7(%arg0: i32) -> (i32, i32) {
    %c0_i32 = arith.constant 0 : i32
    %c0_i32_0 = arith.constant 0 : i32
    %c0_i32_1 = arith.constant 0 : i32
    return %c0_i32, %c0_i32_0 : i32, i32
  }
  func.func @transform_8(%arg0: i32) -> (i32, i32) {
    %c0_i32 = arith.constant 0 : i32
    %c0_i32_0 = arith.constant 0 : i32
    %c0_i32_1 = arith.constant 0 : i32
    return %c0_i32, %c0_i32_0 : i32, i32
  }
  func.func @transform_9(%arg0: i32) -> (i32, i32) {
    %c0_i32 = arith.constant 0 : i32
    %c0_i32_0 = arith.constant 0 : i32
    return %arg0, %c0_i32 : i32, i32
  }
}

</mosaic_0001>

<bundles_post_ra>
// kernel: tpu_custom_call.1
= control target key start
LH: loop header
LB: loop body
LE: loop exit
PB: predicated region body
PF: predicated region fallthrough
CT: control target
= control target key end

     0   :  { %14 = vsyncpa [#allocation3], 0  ;;  %s983_s0 = inlined_call_operand.hbm [shape: f32[8,64], index: 0, kind: input, shape index: {}]   ;;  %s984_s1 = inlined_call_operand.hbm [shape: bf16[64,128], index: 1, kind: input, shape index: {}]   ;;  %s985_s2 = inlined_call_operand.vmem [shape: f32[1,128], index: 2, kind: input, shape index: {}]   ;;  %s986_s3 = inlined_call_operand.hbm [shape: bf16[128,128], index: 3, kind: input, shape index: {}]   ;;  %s987_s4 = inlined_call_operand.vmem [shape: f32[1,128], index: 4, kind: input, shape index: {}]   ;;  %s988_s5 = inlined_call_operand.hbm [shape: bf16[128,128], index: 5, kind: input, shape index: {}]   ;;  %s989_s6 = inlined_call_operand.vmem [shape: f32[1,128], index: 6, kind: input, shape index: {}]   ;;  %s990_s7 = inlined_call_operand.hbm [shape: bf16[128,128], index: 7, kind: input, shape index: {}]   ;;  %s991_s8 = inlined_call_operand.vmem [shape: f32[1,128], index: 8, kind: input, shape index: {}]   ;;  %s992_s9 = inlined_call_operand.hbm [shape: f32[8,128], index: 9, kind: output, shape index: {}]  }
   0x1   :  { %15 = vsyncpa [#allocation6], 0 }
   0x2   :  { %16 = vsyncpa [#allocation9], 0 }
   0x3   :  { %17 = vsyncpa [#allocation4], 0  ;;  %s845_s30 = smov [#allocation5]  }
   0x4   :  { %s33_s10 = sshll.u32 %s845_s30, 4  ;;  %s34_s10 = int_to_ptr.vmem [resolvable:$true] %s33_s10 }
   0x5   :  { %s725_s11 = scalar_lea.vmem %s34_s10, 512  ;;  %p730_p1 = scmp.lt.s32.totalorder %s34_s10, %s34_s10 }
   0x6   :  { %p726_p0 = scmp.ne.s32.totalorder %s34_s10, %s725_s11  ;;  %p731_p2 = scmp.lt.s32.totalorder %s725_s11, %s725_s11 }
   0x8   :  { %p732_p3 = por %p731_p2, %p730_p1 }
   0xa   :  { %p733_p4 = pnand %p732_p3, %p726_p0 }
   0xc   :  { %736 = shalt.err (!%p733_p4)
}
   0xd   :  { %s846_s12 = smov 64   ;;  %s847_s13 = smov 4  }
   0xe   :  { %39 = dma.hbm_to_vmem [thread:$0]  %s984_s1, 512, %s34_s10, [#allocation6], %s846_s12, %s846_s12, %s847_s13  }
   0xf   :  { %s848_s16 = smov [#allocation8]   ;;  %s849_s18 = smov [#allocation2]  }
  0x10   :  { %s61_s17 = sshll.u32 %s848_s16, 4  ;;  %s24_s19 = sshll.u32 %s849_s18, 4  ;;  %s62_s17 = int_to_ptr.vmem [resolvable:$true] %s61_s17  ;;  %s25_s19 = int_to_ptr.vmem [resolvable:$true] %s24_s19 }
  0x11   :  { %s745_s20 = scalar_lea.vmem %s62_s17, 1024  ;;  %p750_p6 = scmp.lt.s32.totalorder %s62_s17, %s62_s17 }
  0x12   :  { %p746_p5 = scmp.ne.s32.totalorder %s62_s17, %s745_s20  ;;  %p751_p7 = scmp.lt.s32.totalorder %s745_s20, %s745_s20 }
  0x14   :  { %p752_p8 = por %p751_p7, %p750_p6 }
  0x16   :  { %p753_p9 = pnand %p752_p8, %p746_p5 }
  0x18   :  { %756 = shalt.err (!%p753_p9)
}
  0x19   :  { %67 = dma.hbm_to_vmem [thread:$0]  %s988_s5, 1024, %s62_s17, [#allocation9], %s846_s12, %s846_s12, %s847_s13  }
  0x1a   :  { %s765_s1 = scalar_lea.vmem %s25_s19, 128  ;;  %p770_p11 = scmp.lt.s32.totalorder %s25_s19, %s25_s19 }
  0x1b   :  { %p766_p10 = scmp.ne.s32.totalorder %s25_s19, %s765_s1  ;;  %p771_p12 = scmp.lt.s32.totalorder %s765_s1, %s765_s1 }
  0x1d   :  { %p772_p13 = por %p771_p12, %p770_p11 }
  0x1f   :  { %p773_p0 = pnand %p772_p13, %p766_p10 }
  0x21   :  { %776 = shalt.err (!%p773_p0)
}
  0x22   :  { %27 = dma.hbm_to_vmem [thread:$0]  %s983_s0, 128, %s25_s19, [#allocation3]  }
  0x23   :  { %s850_s25 = smov [#allocation7]   ;;  %s851_s27 = smov [#allocation10]  }
  0x24   :  { %s47_s26 = sshll.u32 %s850_s25, 4  ;;  %s75_s28 = sshll.u32 %s851_s27, 4  ;;  %s48_s26 = int_to_ptr.vmem [resolvable:$true] %s47_s26  ;;  %s76_s28 = int_to_ptr.vmem [resolvable:$true] %s75_s28 }
  0x25   :  { %s785_s29 = scalar_lea.vmem %s48_s26, 1024  ;;  %p790_p2 = scmp.lt.s32.totalorder %s48_s26, %s48_s26 }
  0x26   :  { %p786_p1 = scmp.ne.s32.totalorder %s48_s26, %s785_s29  ;;  %p791_p3 = scmp.lt.s32.totalorder %s785_s29, %s785_s29 }
  0x28   :  { %p792_p4 = por %p791_p3, %p790_p2 }
  0x2a   :  { %p793_p5 = pnand %p792_p4, %p786_p1 }
  0x2c   :  { %796 = shalt.err (!%p793_p5)
}
  0x2d   :  { %53 = dma.hbm_to_vmem [thread:$0]  %s986_s3, 1024, %s48_s26, [#allocation6], %s846_s12, %s846_s12, %s847_s13  }
  0x2e   :  { %s805_s0 = scalar_lea.vmem %s76_s28, 1024  ;;  %p810_p7 = scmp.lt.s32.totalorder %s76_s28, %s76_s28 }
  0x2f   :  { %p806_p6 = scmp.ne.s32.totalorder %s76_s28, %s805_s0  ;;  %p811_p8 = scmp.lt.s32.totalorder %s805_s0, %s805_s0 }
  0x31   :  { %p812_p9 = por %p811_p8, %p810_p7 }
  0x33   :  { %p813_p10 = pnand %p812_p9, %p806_p6 }
  0x35   :  { %816 = shalt.err (!%p813_p10)
}
  0x36   :  { %81 = dma.hbm_to_vmem [thread:$0]  %s990_s7, 1024, %s76_s28, [#allocation9], %s846_s12, %s846_s12, %s847_s13  }
  0x37   :  { %837 = dma.done.wait [#allocation3], 128  }
  0x38   :  { %838 = vsyncadd [#allocation3], 4294967168 }
  0x39   :  { %839 = dma.done.wait [#allocation6], 1536  }
  0x3a   :  { %840 = vsyncadd [#allocation6], 4294965760 }
  0x3b   :  { %841 = dma.done.wait [#allocation9], 2048  }
  0x3c   :  { %842 = vsyncadd [#allocation9], 4294965248  ;;  %v852_v0 = vmov 0.0   ;;  %vm853_vm0 = vmmov 0   ;;  %v689_v1 = vld [vmem:[#allocation5 + $0x18] sm:$0xff]   ;;  %v690_v2 = vld [vmem:[#allocation5 + $0x10] sm:$0xff]  }
  0x3d   :  { %607 = vmatprep.subr.bf16.mxu0 %v852_v0  ;;  %615 = vmatprep.mubr.msk.bf16.mxu0 %vm853_vm0, %v852_v0  ;;  %v693_v3 = vld [vmem:[#allocation7 + $0x38] sm:$0xff]   ;;  %v691_v4 = vld [vmem:[#allocation5 + $0x8] sm:$0xff]   ;;  %v694_v5 = vld [vmem:[#allocation7 + $0x30] sm:$0xff]   ;;  %vm141_vm1 = vcmask 523264   ;;  %s854_s16 = smov [#allocation11]  }
  0x3e   :  { %619 = vmatprep.subr.bf16.mxu1 %v852_v0  ;;  %635 = vmatprep.mubr.msk.bf16.mxu1 %vm853_vm0, %v852_v0  ;;  %v692_v6 = vld [vmem:[#allocation5] sm:$0xff]   ;;  %v100_v7 = vld [vmem:[#allocation2] sm:$0xff]  ;;  %v695_v8 = vld [vmem:[#allocation7 + $0x28] sm:$0xff]   ;;  %s531_s17 = sshll.u32 %s854_s16, 4  ;;  %s532_s17 = int_to_ptr.vmem [resolvable:$true] %s531_s17 }
  0x3f   :  { %608 = vmatpush3.bf16.msra.mxu0 %v689_v1  ;;  %620 = vmatpush3.bf16.msra.mxu1 %v693_v3  ;;  %v101_v9 = vpack.c.bf16 %v100_v7, %v100_v7  ;;  %v696_v10 = vld [vmem:[#allocation7 + $0x20] sm:$0xff]   ;;  %v697_v11 = vld [vmem:[#allocation7 + $0x18] sm:$0xff]   ;;  %v698_v12 = vld [vmem:[#allocation7 + $0x10] sm:$0xff]   ;;  %p822_p12 = scmp.lt.s32.totalorder %s532_s17, %s532_s17 }
  0x40   :  { %609 = vmatprep.subr.bf16.mxu0 %v852_v0  ;;  %621 = vmatprep.subr.bf16.mxu1 %v852_v0  ;;  %v699_v13 = vld [vmem:[#allocation7 + $0x8] sm:$0xff]   ;;  %v700_v14 = vld [vmem:[#allocation7] sm:$0xff]   ;;  %v701_v15 = vld [vmem:[#allocation8 + $0x38] sm:$0xff]  }
  0x41   :  { %v702_v16 = vld [vmem:[#allocation8 + $0x30] sm:$0xff]   ;;  %v703_v17 = vld [vmem:[#allocation8 + $0x28] sm:$0xff]   ;;  %v704_v18 = vld [vmem:[#allocation8 + $0x20] sm:$0xff]  }
  0x42   :  { %v705_v19 = vld [vmem:[#allocation8 + $0x18] sm:$0xff]   ;;  %v706_v20 = vld [vmem:[#allocation8 + $0x10] sm:$0xff]   ;;  %v707_v29 = vld [vmem:[#allocation8 + $0x8] sm:$0xff]  }
  0x43   :  { %610 = vmatpush3.bf16.msra.mxu0 %v690_v2  ;;  %622 = vmatpush3.bf16.msra.mxu1 %v694_v5  ;;  %v542_v21 = vld [vmem:[%s985_s2] ss:$0 sm:$0xff]  ;;  %v708_v30 = vld [vmem:[#allocation8] sm:$0xff]   ;;  %v710_v32 = vld [vmem:[#allocation10 + $0x30] sm:$0xff]  }
  0x44   :  { %611 = vmatprep.subr.bf16.mxu0 %v852_v0  ;;  %623 = vmatprep.subr.bf16.mxu1 %v852_v0  ;;  %v709_v31 = vld [vmem:[#allocation10 + $0x38] sm:$0xff]   ;;  %v711_v33 = vld [vmem:[#allocation10 + $0x28] sm:$0xff]   ;;  %v712_v34 = vld [vmem:[#allocation10 + $0x20] sm:$0xff]  }
  0x45   :  { %v713_v35 = vld [vmem:[#allocation10 + $0x18] sm:$0xff]   ;;  %v714_v36 = vld [vmem:[#allocation10 + $0x10] sm:$0xff]   ;;  %v715_v45 = vld [vmem:[#allocation10 + $0x8] sm:$0xff]  }
  0x46   :  { %v548_v37 = vld [vmem:[%s987_s4] ss:$0 sm:$0xff]  ;;  %v716_v46 = vld [vmem:[#allocation10] sm:$0xff]  }
  0x47   :  { %612 = vmatpush3.bf16.msra.mxu0 %v691_v4  ;;  %624 = vmatpush3.bf16.msra.mxu1 %v695_v8  ;;  %v557_v47 = vld [vmem:[%s989_s6] ss:$0 sm:$0xff]  ;;  %s817_s6 = scalar_lea.vmem %s532_s17, 128 }
  0x48   :  { %613 = vmatprep.subr.bf16.mxu0 %v852_v0  ;;  %625 = vmatprep.subr.bf16.mxu1 %v852_v0  ;;  %v566_v55 = vld [vmem:[%s991_s8] ss:$0 sm:$0xff]  ;;  %p818_p11 = scmp.ne.s32.totalorder %s532_s17, %s817_s6  ;;  %p823_p13 = scmp.lt.s32.totalorder %s817_s6, %s817_s6 }
  0x4a   :  { %p824_p0 = por %p823_p13, %p822_p12 }
  0x4b   :  { %614 = vmatpush3.bf16.msra.mxu0 %v692_v6  ;;  %626 = vmatpush3.bf16.msra.mxu1 %v696_v10 }
  0x4c   :  { %639 = vmatprep.subr.bf16.mxu0 %v852_v0  ;;  %627 = vmatprep.subr.bf16.mxu1 %v852_v0  ;;  %p825_p1 = pnand %p824_p0, %p818_p11 }
  0x4e   :  { %616 = vmatmul.mubr.msk.bf16.vlgmr.msra.gmra.mxu0 %vm141_vm1, %v101_v9 }
  0x4f   :  { %655 = vmatprep.mubr.msk.bf16.mxu0 %vm853_vm0, %v852_v0  ;;  %628 = vmatpush3.bf16.msra.mxu1 %v697_v11 }
  0x50   :  { %629 = vmatprep.subr.bf16.mxu1 %v852_v0  ;;  %640 = vmatpush3.bf16.msra.mxu0 %v701_v15 }
  0x51   :  { %641 = vmatprep.subr.bf16.mxu0 %v852_v0 }
  0x53   :  { %630 = vmatpush3.bf16.msra.mxu1 %v698_v12 }
  0x54   :  { %631 = vmatprep.subr.bf16.mxu1 %v852_v0  ;;  %642 = vmatpush3.bf16.msra.mxu0 %v702_v16 }
  0x55   :  { %643 = vmatprep.subr.bf16.mxu0 %v852_v0 }
  0x57   :  { %632 = vmatpush3.bf16.msra.mxu1 %v699_v13 }
  0x58   :  { %633 = vmatprep.subr.bf16.mxu1 %v852_v0  ;;  %644 = vmatpush3.bf16.msra.mxu0 %v703_v17 }
  0x59   :  { %645 = vmatprep.subr.bf16.mxu0 %v852_v0 }
  0x5b   :  { %634 = vmatpush3.bf16.msra.mxu1 %v700_v14 }
  0x5c   :  { %659 = vmatprep.subr.bf16.mxu1 %v852_v0  ;;  %646 = vmatpush3.bf16.msra.mxu0 %v704_v18 }
  0x5d   :  { %647 = vmatprep.subr.bf16.mxu0 %v852_v0 }
  0x60   :  { %648 = vmatpush3.bf16.msra.mxu0 %v705_v19 }
  0x61   :  { %649 = vmatprep.subr.bf16.mxu0 %v852_v0 }
  0x64   :  { %650 = vmatpush3.bf16.msra.mxu0 %v706_v20 }
  0x65   :  { %651 = vmatprep.subr.bf16.mxu0 %v852_v0 }
  0x68   :  { %652 = vmatpush3.bf16.msra.mxu0 %v707_v29 }
  0x69   :  { %653 = vmatprep.subr.bf16.mxu0 %v852_v0 }
  0x6c   :  { %654 = vmatpush3.bf16.msra.mxu0 %v708_v30 }
 0x10e   :  { %v179_v22 = vpop.f32.mrf.mxu0 }
 0x10f   :  { %v180_v23 = vadd.f32 %v542_v21, %v179_v22 }
 0x110   :  { %v617_v24 = vpop.f32.mrf.mxu0 }
 0x111   :  { %v185_v25 = vmax.f32 %v180_v23, 0.0 }
 0x112   :  { %v182_v26 = vpop.f32.mrf.mxu0 }
 0x113   :  { %v186_v27 = vpack.c.bf16 %v185_v25, %v185_v25 }
 0x114   :  { %v618_v28 = vpop.f32.mrf.mxu0 }
 0x115   :  { %636 = vmatmul.mubr.bf16.vlgmr.msra.gmra.mxu1 %v186_v27 }
 0x116   :  { %675 = vmatprep.mubr.msk.bf16.mxu1 %vm853_vm0, %v852_v0  ;;  %660 = vmatpush3.bf16.msra.mxu1 %v709_v31 }
 0x117   :  { %661 = vmatprep.subr.bf16.mxu1 %v852_v0 }
 0x11a   :  { %662 = vmatpush3.bf16.msra.mxu1 %v710_v32 }
 0x11b   :  { %663 = vmatprep.subr.bf16.mxu1 %v852_v0 }
 0x11e   :  { %664 = vmatpush3.bf16.msra.mxu1 %v711_v33 }
 0x11f   :  { %665 = vmatprep.subr.bf16.mxu1 %v852_v0 }
 0x122   :  { %666 = vmatpush3.bf16.msra.mxu1 %v712_v34 }
 0x123   :  { %667 = vmatprep.subr.bf16.mxu1 %v852_v0 }
 0x126   :  { %668 = vmatpush3.bf16.msra.mxu1 %v713_v35 }
 0x127   :  { %669 = vmatprep.subr.bf16.mxu1 %v852_v0 }
 0x12a   :  { %670 = vmatpush3.bf16.msra.mxu1 %v714_v36 }
 0x12b   :  { %671 = vmatprep.subr.bf16.mxu1 %v852_v0 }
 0x12e   :  { %672 = vmatpush3.bf16.msra.mxu1 %v715_v45 }
 0x12f   :  { %673 = vmatprep.subr.bf16.mxu1 %v852_v0 }
 0x132   :  { %674 = vmatpush3.bf16.msra.mxu1 %v716_v46 }
 0x1d5   :  { %v292_v38 = vpop.f32.mrf.mxu1 }
 0x1d6   :  { %v293_v39 = vadd.f32 %v548_v37, %v292_v38 }
 0x1d7   :  { %v637_v40 = vpop.f32.mrf.mxu1 }
 0x1d8   :  { %v298_v41 = vmax.f32 %v293_v39, 0.0 }
 0x1d9   :  { %v295_v42 = vpop.f32.mrf.mxu1 }
 0x1da   :  { %v299_v43 = vpack.c.bf16 %v298_v41, %v298_v41 }
 0x1db   :  { %v638_v44 = vpop.f32.mrf.mxu1 }
 0x1dc   :  { %656 = vmatmul.mubr.bf16.vlgmr.msra.gmra.mxu0 %v299_v43 }
 0x29c   :  { %v405_v48 = vpop.f32.mrf.mxu0 }
 0x29d   :  { %v406_v49 = vadd.f32 %v557_v47, %v405_v48 }
 0x29e   :  { %v657_v50 = vpop.f32.mrf.mxu0 }
 0x29f   :  { %v411_v51 = vmax.f32 %v406_v49, 0.0 }
 0x2a0   :  { %v408_v52 = vpop.f32.mrf.mxu0 }
 0x2a1   :  { %v412_v53 = vpack.c.bf16 %v411_v51, %v411_v51 }
 0x2a2   :  { %v658_v54 = vpop.f32.mrf.mxu0 }
 0x2a3   :  { %676 = vmatmul.mubr.bf16.vlgmr.msra.gmra.mxu1 %v412_v53 }
 0x363   :  { %v518_v56 = vpop.f32.mrf.mxu1 }
 0x364   :  { %v519_v57 = vadd.f32 %v566_v55, %v518_v56 }
 0x365   :  { %v677_v58 = vpop.f32.mrf.mxu1 }
 0x366   :  { %524 = vst [vmem:[#allocation11] sm:$0xff] %v519_v57 }
 0x367   :  { %v521_v59 = vpop.f32.mrf.mxu1 }
 0x368   :  { %828 = shalt.err (!%p825_p1)
}
 0x369   :  { %534 = dma.vmem_to_hbm [thread:$0]  %s532_s17, 128, %s992_s9, [#allocation4]   ;;  %v678_v60 = vpop.f32.mrf.mxu1 }
 0x36a   :  { %843 = dma.done.wait [#allocation4], 128  }
 0x36b   :  { %844 = vsyncadd [#allocation4], 4294967168 }
 0x36c   :  { %538 = vsyncpa [#allocation3], 1 }
 0x36d   :  { %539 = vsyncpa [#allocation6], 1 }
 0x36e   :  { %540 = vsyncpa [#allocation9], 1 }
 0x36f   :  { %541 = vsyncpa [#allocation4], 1 }

</bundles_post_ra>
